<compile_context>
chip_gen: v5e
topology: v5e:2x2
jax: 0.10.0
libtpu: 0.0.40
codegen_flags: <defaults>
</compile_context>

<pallas_src>
from functools import partial

import jax
import jax.numpy as jnp
from jax.experimental import pallas as pl
from jax.experimental.pallas import tpu as pltpu


def _content_loss_kernel(x_ref, t_ref, out_ref, acc_ref, *,
                         w, inv_n, rows, tile_rows, blocks_per_chunk,
                         needs_mask):
    """Per-chunk SSE accumulation with a single epilogue reduce.

    x_ref   : (tile_rows, 128) VMEM tile of the flattened input (native dtype)
    t_ref   : (tile_rows, 128) VMEM tile of the flattened pre-scaled target
    out_ref : (1, 1) VMEM      per-chunk partial mean (written once, at last j)
    acc_ref : (tile_rows, 128) f32 VMEM scratch accumulator
    """
    j = pl.program_id(1)

    @pl.when(j == 0)
    def _():
        acc_ref[...] = jnp.zeros_like(acc_ref)

    d = x_ref[...].astype(jnp.float32) * w - t_ref[...].astype(jnp.float32)
    sq = d * d

    if needs_mask:
        # Zero rows that belong to block padding past the end of the array
        # (and to duplicate clamped blocks on the last chunk).
        p = pl.program_id(0)
        blk = p * blocks_per_chunk + j
        row = jax.lax.broadcasted_iota(jnp.int32, sq.shape, 0) + blk * tile_rows
        sq = jnp.where(row < rows, sq, 0.0)

    acc_ref[...] += sq            # elementwise only in the hot loop (VPU)

    @pl.when(j == blocks_per_chunk - 1)
    def _():
        # One XLU reduce + one narrow store per chunk (epilogue only).
        out_ref[...] = jnp.sum(acc_ref[...], keepdims=True) * jnp.float32(inv_n)


def content_loss_forward(x, weight, target_scaled, *,
                         block_rows=4096, num_chunks=2, lanes=128):
    """Pallas equivalent of ContentLoss.forward.

    Returns (output, loss):
      output == x                     (identity pass-through, as in PyTorch)
      loss   == mean((x * weight - target_scaled) ** 2)
    """
    assert x.shape == target_scaled.shape
    n_elems = x.size

    if n_elems % lanes == 0:
        # Free view: no extra HBM traffic.
        xf = x.reshape(-1, lanes)
        tf = target_scaled.reshape(-1, lanes)
    else:
        # Fallback for non-lane-aligned sizes: zero-pad flat views to a
        # multiple of 128.  Padded zeros contribute 0 to the SSE; only the
        # mean divisor uses the true element count.
        padded = pl.cdiv(n_elems, lanes) * lanes
        xf = (jnp.zeros((padded,), x.dtype)
              .at[:n_elems].set(x.reshape(-1)).reshape(-1, lanes))
        tf = (jnp.zeros((padded,), target_scaled.dtype)
              .at[:n_elems].set(target_scaled.reshape(-1)).reshape(-1, lanes))

    rows = xf.shape[0]

    # ~2 MiB per f32 input block; clamp (to a multiple of 8) for small inputs.
    tile_rows = max(8, min(int(block_rows), ((rows + 7) // 8) * 8))
    tile_rows = ((tile_rows + 7) // 8) * 8

    total_blocks = pl.cdiv(rows, tile_rows)
    num_chunks = max(1, min(int(num_chunks), total_blocks))
    blocks_per_chunk = pl.cdiv(total_blocks, num_chunks)
    needs_mask = (num_chunks * blocks_per_chunk * tile_rows) != rows
    last_block = total_blocks - 1

    def xt_map(p, j):
        # Clamp so out-of-range chunk steps re-read a valid block; the in-kernel
        # row mask zeroes their contribution.
        return (jnp.minimum(p * blocks_per_chunk + j, last_block), 0)

    kernel = partial(
        _content_loss_kernel,
        w=float(weight),
        inv_n=1.0 / float(n_elems),
        rows=rows,
        tile_rows=tile_rows,
        blocks_per_chunk=blocks_per_chunk,
        needs_mask=needs_mask,
    )

    bytes_accessed = (xf.size * xf.dtype.itemsize
                      + tf.size * tf.dtype.itemsize
                      + num_chunks * 4)

    partials = pl.pallas_call(
        kernel,
        out_shape=jax.ShapeDtypeStruct((num_chunks, 1), jnp.float32),
        grid_spec=pltpu.PrefetchScalarGridSpec(
            num_scalar_prefetch=0,
            grid=(num_chunks, blocks_per_chunk),
            in_specs=[
                pl.BlockSpec((tile_rows, lanes), xt_map),
                pl.BlockSpec((tile_rows, lanes), xt_map),
            ],
            out_specs=pl.BlockSpec((1, 1), lambda p, j: (p, 0)),
            scratch_shapes=[pltpu.VMEM((tile_rows, lanes), jnp.float32)],
        ),
        compiler_params=pltpu.CompilerParams(
            # Leading chunk axis is "parallel" -> split across TCs on v7x
            # megacore; row/reduction axis stays "arbitrary".
            dimension_semantics=("parallel", "arbitrary")),
        cost_estimate=pl.CostEstimate(
            flops=4 * n_elems, transcendentals=0,
            bytes_accessed=bytes_accessed),
    )(xf, tf)

    loss = jnp.sum(partials)

    # forward() returns the input unchanged; the loss is stashed as state.
    return x, loss


class ContentLossPallas:
    """Mirror of the PyTorch ContentLoss module (forward only)."""

    def __init__(self, weight, target):
        self._weight = float(weight)
        # target.detach() * weight  (keep native dtype in HBM; cast in-kernel)
        target = jnp.asarray(target)
        self._target = (target * self._weight).astype(target.dtype)
        self.loss = None
        self.output = None

    def forward(self, x):
        out, loss = content_loss_forward(x, self._weight, self._target)
        self.loss = loss
        self.output = out
        return out

    # TODO(synk): backward() relies on PyTorch autograd graph state; in JAX,
    # differentiate the loss with jax.grad instead of replicating it here.


if __name__ == "__main__":
    key = jax.random.PRNGKey(0)
    k_in, k_tgt = jax.random.split(key)

    # NCHW feature map, small shapes.
    N, C, H, W = 2, 4, 16, 16
    x = jax.random.normal(k_in, (N, C, H, W), dtype=jnp.float32)
    target = jax.random.normal(k_tgt, (N, C, H, W), dtype=jnp.float32)
    weight = 0.7  # deterministic scalar content weight

    module = ContentLossPallas(weight, target)
    out = module.forward(x)
    out = jax.block_until_ready(out)
    loss = jax.block_until_ready(module.loss)

    # Pure-JAX reference check (MSE with mean reduction, like nn.MSELoss()).
    ref_loss = jnp.mean((x * weight - target * weight) ** 2)
    assert out.shape == x.shape and out.dtype == x.dtype
    assert jnp.allclose(out, x)
    assert jnp.allclose(loss, ref_loss, rtol=1e-5, atol=1e-6)

    print("KERNEL_OK")
</pallas_src>

<mosaic_0001>
module attributes {stable_mosaic.version = 11 : i64} {
  func.func @_content_loss_kernel(%arg0: i32, %arg1: i32, %arg2: memref<16x128xf32, #tpu.memory_space<vmem>>, %arg3: memref<16x128xf32, #tpu.memory_space<vmem>>, %arg4: memref<1x1xf32, #tpu.memory_space<vmem>>, %arg5: memref<16x128xf32, #tpu.memory_space<vmem>>) attributes {dimension_semantics = [#tpu.dimension_semantics<parallel>, #tpu.dimension_semantics<arbitrary>], iteration_bounds = array<i64: 1, 1>, scalar_prefetch = 0 : i64, scratch_operands = 1 : i64, tpu.core_type = #tpu.core_type<tc>, window_params = [{transform_indices = @transform_0, window_bounds = array<i64: 16, 128>}, {transform_indices = @transform_1, window_bounds = array<i64: 16, 128>}, {transform_indices = @transform_2, window_bounds = array<i64: 1, 1>}]} {
    %c0_i32 = arith.constant 0 : i32
    %0 = arith.cmpi eq, %arg1, %c0_i32 : i32
    %1 = arith.extui %0 : i1 to i32
    %c0_i32_0 = arith.constant 0 : i32
    %2 = arith.cmpi ne, %1, %c0_i32_0 : i32
    scf.if %2 {
      %cst_10 = arith.constant 0.000000e+00 : f32
      %15 = vector.broadcast %cst_10 : f32 to vector<16x128xf32>
      %c0_11 = arith.constant 0 : index
      %c0_12 = arith.constant 0 : index
      %16 = vector.load %arg5[%c0_11, %c0_12] : memref<16x128xf32, #tpu.memory_space<vmem>>, vector<16x128xf32>
      tpu.vector_store %arg5[%c0_11, %c0_12], %15 {strides = array<i32>} : memref<16x128xf32, #tpu.memory_space<vmem>>, vector<16x128xf32>,
    } else {
    }
    %c0 = arith.constant 0 : index
    %c0_1 = arith.constant 0 : index
    %3 = vector.load %arg2[%c0, %c0_1] : memref<16x128xf32, #tpu.memory_space<vmem>>, vector<16x128xf32>
    %cst = arith.constant 0.699999988 : f32
    %4 = vector.broadcast %cst : f32 to vector<16x128xf32>
    %5 = arith.mulf %3, %4 : vector<16x128xf32>
    %c0_2 = arith.constant 0 : index
    %c0_3 = arith.constant 0 : index
    %6 = vector.load %arg3[%c0_2, %c0_3] : memref<16x128xf32, #tpu.memory_space<vmem>>, vector<16x128xf32>
    %7 = arith.subf %5, %6 : vector<16x128xf32>
    %8 = arith.mulf %7, %7 : vector<16x128xf32>
    %c0_4 = arith.constant 0 : index
    %c0_5 = arith.constant 0 : index
    %9 = vector.load %arg5[%c0_4, %c0_5] : memref<16x128xf32, #tpu.memory_space<vmem>>, vector<16x128xf32>
    %10 = arith.addf %9, %8 : vector<16x128xf32>
    %c0_6 = arith.constant 0 : index
    %c0_7 = arith.constant 0 : index
    %11 = vector.load %arg5[%c0_6, %c0_7] : memref<16x128xf32, #tpu.memory_space<vmem>>, vector<16x128xf32>
    tpu.vector_store %arg5[%c0_6, %c0_7], %10 {strides = array<i32>} : memref<16x128xf32, #tpu.memory_space<vmem>>, vector<16x128xf32>,
    %c0_i32_8 = arith.constant 0 : i32
    %12 = arith.cmpi eq, %arg1, %c0_i32_8 : i32
    %13 = arith.extui %12 : i1 to i32
    %c0_i32_9 = arith.constant 0 : i32
    %14 = arith.cmpi ne, %13, %c0_i32_9 : i32
    scf.if %14 {
      %c0_10 = arith.constant 0 : index
      %c0_11 = arith.constant 0 : index
      %15 = vector.load %arg5[%c0_10, %c0_11] : memref<16x128xf32, #tpu.memory_space<vmem>>, vector<16x128xf32>
      %16 = vector.shape_cast %15 : vector<16x128xf32> to vector<1x16x128xf32>
      %cst_12 = arith.constant dense<0.000000e+00> : vector<1xf32>
      %17 = vector.multi_reduction <add>, %16, %cst_12 [1, 2] : vector<1x16x128xf32> to vector<1xf32>
      %18 = vector.shape_cast %17 : vector<1xf32> to vector<1x1x1xf32>
      %19 = vector.extract %18[0, 0, 0] : f32 from vector<1x1x1xf32>
      %20 = vector.broadcast %19 : f32 to vector<1x1xf32>
      %cst_13 = arith.constant 4.8828125E-4 : f32
      %21 = vector.broadcast %cst_13 : f32 to vector<1x1xf32>
      %22 = arith.mulf %20, %21 : vector<1x1xf32>
      %c0_14 = arith.constant 0 : index
      %c0_15 = arith.constant 0 : index
      %23 = vector.load %arg4[%c0_14, %c0_15] : memref<1x1xf32, #tpu.memory_space<vmem>>, vector<1x1xf32>
      tpu.vector_store %arg4[%c0_14, %c0_15], %22 {strides = array<i32>} : memref<1x1xf32, #tpu.memory_space<vmem>>, vector<1x1xf32>,
    } else {
    }
    return
  }
  func.func @transform_0(%arg0: i32, %arg1: i32) -> (i32, i32) {
    %c1_i32 = arith.constant 1 : i32
    %0 = arith.muli %arg0, %c1_i32 : i32
    %1 = arith.addi %0, %arg1 : i32
    %c0_i32 = arith.constant 0 : i32
    %2 = arith.minsi %1, %c0_i32 : i32
    %c0_i32_0 = arith.constant 0 : i32
    %c0_i32_1 = arith.constant 0 : i32
    return %2, %c0_i32_0 : i32, i32
  }
  func.func @transform_1(%arg0: i32, %arg1: i32) -> (i32, i32) {
    %c1_i32 = arith.constant 1 : i32
    %0 = arith.muli %arg0, %c1_i32 : i32
    %1 = arith.addi %0, %arg1 : i32
    %c0_i32 = arith.constant 0 : i32
    %2 = arith.minsi %1, %c0_i32 : i32
    %c0_i32_0 = arith.constant 0 : i32
    %c0_i32_1 = arith.constant 0 : i32
    return %2, %c0_i32_0 : i32, i32
  }
  func.func @transform_2(%arg0: i32, %arg1: i32) -> (i32, i32) {
    %c0_i32 = arith.constant 0 : i32
    %c0_i32_0 = arith.constant 0 : i32
    return %arg0, %c0_i32 : i32, i32
  }
}

</mosaic_0001>

<bundles_post_ra>
// kernel: tpu_custom_call.1
= control target key start
LH: loop header
LB: loop body
LE: loop exit
PB: predicated region body
PF: predicated region fallthrough
CT: control target
= control target key end

     0   :  { %7 = vsyncpa [#allocation4], 0  ;;  %s241_s0 = inlined_call_operand.hbm [shape: f32[16,128], index: 0, kind: input, shape index: {}]   ;;  %s242_s1 = inlined_call_operand.hbm [shape: f32[16,128], index: 1, kind: input, shape index: {}]   ;;  %s243_s2 = inlined_call_operand.hbm [shape: f32[1,1], index: 2, kind: output, shape index: {}]  }
   0x1   :  { %8 = vsyncpa [#allocation7], 0 }
   0x2   :  { %9 = vsyncpa [#allocation5], 0  ;;  %s20_s11 = sshll.u32 %s241_s0, 4  ;;  %s212_s12 = smov [#allocation3]   ;;  %s21_s11 = int_to_ptr.hbm [resolvable:$true] %s20_s11 }
   0x3   :  { %s22_s13 = sshll.u32 %s212_s12, 4  ;;  %s39_s16 = sshll.u32 %s242_s1, 4  ;;  %s23_s13 = int_to_ptr.vmem [resolvable:$true] %s22_s13  ;;  %s40_s16 = int_to_ptr.hbm [resolvable:$true] %s39_s16 }
   0x4   :  { %s213_s17 = smov 128   ;;  %s214_s18 = smov 8  }
   0x5   :  { %28 = dma.hbm_to_vmem [thread:$0]  %s21_s11, 256, %s23_s13, [#allocation4], %s213_s17, %s213_s17, %s214_s18  }
   0x6   :  { %s215_s19 = smov [#allocation6]  }
   0x7   :  { %s41_s20 = sshll.u32 %s215_s19, 4  ;;  %s42_s20 = int_to_ptr.vmem [resolvable:$true] %s41_s20 }
   0x8   :  { %47 = dma.hbm_to_vmem [thread:$0]  %s40_s16, 256, %s42_s20, [#allocation7], %s213_s17, %s213_s17, %s214_s18  }
   0x9   :  { %206 = dma.done.wait [#allocation4], 256  }
   0xa   :  { %207 = vsyncadd [#allocation4], 4294967040 }
   0xb   :  { %208 = dma.done.wait [#allocation7], 256  }
   0xc   :  { %209 = vsyncadd [#allocation7], 4294967040  ;;  %v70_v0 = vld [vmem:[#allocation3] sm:$0xff]  ;;  %v71_v1 = vld [vmem:[#allocation3 + $0x8] sm:$0xff]  ;;  %s216_s0 = smov [#allocation8]   ;;  %s112_s23 = sshll.u32 %s243_s2, 4  ;;  %s113_s23 = int_to_ptr.hbm [resolvable:$true] %s112_s23 }
   0xd   :  { %v74_v2 = vld [vmem:[#allocation6] sm:$0xff]  ;;  %v72_v3 = vmul.f32 0.7, %v70_v0  ;;  %v73_v4 = vmul.f32 0.7, %v71_v1  ;;  %v75_v5 = vld [vmem:[#allocation6 + $0x8] sm:$0xff] }
   0xe   :  { %s110_s1 = sshll.u32 %s216_s0, 4  ;;  %vm103_vm0 = vcmask 0   ;;  %s111_s1 = int_to_ptr.vmem [resolvable:$true] %s110_s1 }
   0xf   :  { %v76_v6 = vsub.f32 %v72_v3, %v74_v2  ;;  %v77_v7 = vsub.f32 %v73_v4, %v75_v5 }
  0x11   :  { %v78_v8 = vmul.f32 %v76_v6, %v76_v6  ;;  %v79_v9 = vmul.f32 %v77_v7, %v77_v7 }
  0x13   :  { %v91_v10 = vadd.f32 %v79_v9, %v78_v8 }
  0x15   :  { %92 = vadd.xlane.f32.xlu0 %v91_v10 }
  0x88   :  { %v93_v11 = vpop.xlane.xlu0 %92 }
  0x89   :  { %v94_v12 = vrot.slane %v93_v11, 4 }
  0x8b   :  { %v95_v13 = vadd.f32 %v94_v12, %v93_v11 }
  0x8d   :  { %v96_v14 = vrot.slane %v95_v13, 2 }
  0x8f   :  { %v97_v15 = vadd.f32 %v96_v14, %v95_v13 }
  0x91   :  { %v98_v16 = vrot.slane %v97_v15, 1 }
  0x93   :  { %v99_v17 = vadd.f32 %v98_v16, %v97_v15 }
  0x95   :  { %127 = vpush %v99_v17 }
  0xc6   :  { %s128_s24 = spop %127 }
  0xc7   :  { %v101_v18 = vstv %s128_s24 }
  0xc8   :  { %v102_v19 = vmul.f32 0.00048828125, %v101_v18 }
  0xca   :  { %104 = vst.msk [vmem:[#allocation8] sm:$0x1] %vm103_vm0, %v102_v19 }
  0xcb   :  { %115 = dma.vmem_to_hbm [thread:$0]  %s111_s1, 16, %s113_s23, [#allocation5]  }
  0xcc   :  { %210 = dma.done.wait [#allocation5], 16  }
  0xcd   :  { %211 = vsyncadd [#allocation5], 4294967280 }
  0xce   :  { %120 = vsyncpa [#allocation4], 1 }
  0xcf   :  { %121 = vsyncpa [#allocation7], 1 }
  0xd0   :  { %122 = vsyncpa [#allocation5], 1 }

</bundles_post_ra>
